<compile_context>
chip_gen: v7x
topology: tpu7x:2x2x1
jax: 0.10.0
libtpu: 0.0.40
codegen_flags: <defaults>
</compile_context>

<pallas_src>
import functools

import jax
import jax.numpy as jnp
from jax import lax
from jax.experimental import pallas as pl
from jax.experimental.pallas import tpu as pltpu

IN_FEATURES = 20
OUT_FEATURES = 2
_MIB = 1024 * 1024


# ----------------------------- kernels ------------------------------------- #
def _linear_kernel_bn(x_ref, w_ref, o_ref):
    """Gridless path: o (B, N) = x (B, K) contracted with w (N, K) on K."""
    o_ref[...] = lax.dot_general(
        x_ref[...],
        w_ref[...],
        dimension_numbers=(((1,), (1,)), ((), ())),
        preferred_element_type=jnp.float32,
    ).astype(o_ref.dtype)


def _linear_kernel_nb(x_ref, w_ref, o_ref):
    """Tiled path: o (N, Bt) = w (N, K) contracted with x (Bt, K) on K.

    Producing (N, Bt) directly keeps the output block lane-dense (Bt on lanes,
    full unmasked vst) with no transpose op in the kernel.
    """
    o_ref[...] = lax.dot_general(
        w_ref[...],
        x_ref[...],
        dimension_numbers=(((1,), (1,)), ((), ())),
        preferred_element_type=jnp.float32,
    ).astype(o_ref.dtype)


# ----------------------------- helpers ------------------------------------- #
def _cost_estimate(B, K, N, itemsize=4):
    return pl.CostEstimate(
        flops=2 * B * K * N,
        transcendentals=0,
        bytes_accessed=itemsize * (B * K + N * K + B * N),
    )


def _tpu_config():
    """Generation-aware sizing: (vmem_limit_bytes, gridless_cutoff, max_batch_tile)."""
    vmem_capacity = 128 * _MIB  # v5e / v6e physical VMEM per TC
    try:
        info = pltpu.get_tpu_info()
        vmem_capacity = int(getattr(info, "vmem_capacity_bytes", vmem_capacity))
    except Exception:
        pass
    if vmem_capacity <= 64 * _MIB:
        # v7x-class: 64 MiB / TC, 2 TCs per chip -> engage the parallel grid early
        # and keep the per-step VMEM budget at ~48 MiB.
        return 48 * _MIB, 2048, 16384
    # v5e / v6e: 128 MiB physical (16 / 32 MiB default scoped) -> raise the limit
    # so MB-scale tiles amortize the ~0.35 us/step pipeline overhead.
    return 96 * _MIB, 8192, 16384


def _pick_batch_tile(B, max_tile, min_steps=8):
    """Largest tile <= max_tile that still yields >= min_steps grid steps (multiple of 128)."""
    tile = -(-B // min_steps)                  # ceil(B / min_steps)
    tile = ((tile + 127) // 128) * 128         # lane multiple for the (N, Bt) output block
    return max(128, min(tile, max_tile))


# ----------------------------- entry points -------------------------------- #
@jax.jit
def _gridless_forward(x, weight):
    """Small / moderate batch: one VMEM-resident call, no pipeline machinery."""
    B, K = x.shape
    N = weight.shape[0]
    return pl.pallas_call(
        _linear_kernel_bn,
        out_shape=jax.ShapeDtypeStruct((B, N), x.dtype),
        in_specs=[
            pl.BlockSpec(memory_space=pltpu.MemorySpace.VMEM),
            pl.BlockSpec(memory_space=pltpu.MemorySpace.VMEM),
        ],
        out_specs=pl.BlockSpec(memory_space=pltpu.MemorySpace.VMEM),
        cost_estimate=_cost_estimate(B, K, N, x.dtype.itemsize),
    )(x, weight)


@functools.partial(jax.jit, static_argnames=("batch_tile", "vmem_limit"))
def _tiled_forward(x, weight, *, batch_tile, vmem_limit):
    """Large batch: B tiled, batch axis parallel across TensorCores, lane-dense output."""
    B, K = x.shape
    N = weight.shape[0]
    grid = (pl.cdiv(B, batch_tile),)
    out_t = pl.pallas_call(
        _linear_kernel_nb,
        out_shape=jax.ShapeDtypeStruct((N, B), x.dtype),
        grid=grid,
        in_specs=[
            pl.BlockSpec((batch_tile, K), lambda i: (i, 0)),
            pl.BlockSpec((N, K), lambda i: (0, 0)),
        ],
        out_specs=pl.BlockSpec((N, batch_tile), lambda i: (0, i)),
        compiler_params=pltpu.CompilerParams(
            dimension_semantics=("parallel",),
            vmem_limit_bytes=vmem_limit,
        ),
        cost_estimate=_cost_estimate(B, K, N, x.dtype.itemsize),
    )(x, weight)
    return out_t.T  # hand (B, N) back to match nn.Linear convention


def linear_test_forward(x, weight):
    """x: (B, 20) float32; weight: (2, 20) float32 (PyTorch layout). Returns x @ weight.T."""
    B, K = x.shape
    N, K2 = weight.shape
    assert K == K2 == IN_FEATURES and N == OUT_FEATURES, "shape mismatch with linear_test"

    vmem_limit, gridless_cutoff, max_tile = _tpu_config()
    if B <= gridless_cutoff:
        return _gridless_forward(x, weight)
    batch_tile = _pick_batch_tile(B, max_tile)
    return _tiled_forward(x, weight, batch_tile=batch_tile, vmem_limit=vmem_limit)


# ----------------------------- self-test ----------------------------------- #
if __name__ == "__main__":
    key = jax.random.PRNGKey(0)
    kx, kw, kx2 = jax.random.split(key, 3)

    B = 8
    # Deterministic parameter init (mimics PyTorch kaiming-uniform bound 1/sqrt(fan_in)).
    bound = 1.0 / jnp.sqrt(jnp.float32(IN_FEATURES))
    weight = jax.random.uniform(kw, (OUT_FEATURES, IN_FEATURES), jnp.float32, -bound, bound)
    x = jax.random.normal(kx, (B, IN_FEATURES), jnp.float32)

    out = jax.block_until_ready(linear_test_forward(x, weight))
    ref = x @ weight.T
    assert out.shape == (B, OUT_FEATURES)
    assert jnp.allclose(out, ref, atol=1e-5, rtol=1e-5)

    # Also exercise the tiled, lane-dense-output path at a modest size.
    B2 = 1024
    x2 = jax.random.normal(kx2, (B2, IN_FEATURES), jnp.float32)
    out2 = jax.block_until_ready(
        _tiled_forward(x2, weight, batch_tile=256, vmem_limit=64 * _MIB)
    )
    ref2 = x2 @ weight.T
    assert out2.shape == (B2, OUT_FEATURES)
    assert jnp.allclose(out2, ref2, atol=1e-5, rtol=1e-5)

    print("KERNEL_OK")
</pallas_src>

<mosaic_0001>
module attributes {stable_mosaic.version = 11 : i64} {
  func.func @_linear_kernel_bn(%arg0: memref<8x20xf32, #tpu.memory_space<vmem>>, %arg1: memref<2x20xf32, #tpu.memory_space<vmem>>, %arg2: memref<8x2xf32, #tpu.memory_space<vmem>>) attributes {dimension_semantics = [], scalar_prefetch = 0 : i64, scratch_operands = 0 : i64, tpu.core_type = #tpu.core_type<tc>} {
    %c0 = arith.constant 0 : index
    %c0_0 = arith.constant 0 : index
    %0 = vector.load %arg0[%c0, %c0_0] : memref<8x20xf32, #tpu.memory_space<vmem>>, vector<8x20xf32>
    %c0_1 = arith.constant 0 : index
    %c0_2 = arith.constant 0 : index
    %1 = vector.load %arg1[%c0_1, %c0_2] : memref<2x20xf32, #tpu.memory_space<vmem>>, vector<2x20xf32>
    %cst = arith.constant dense<0.000000e+00> : vector<8x2xf32>
    %2 = tpu.matmul %0, %1, %cst {dimension_numbers = #tpu.dot_dimension_numbers<[1], [1], [0], [0], [0, 0, 1, 0], [], []>} : vector<8x20xf32>, vector<2x20xf32>, vector<8x2xf32> -> vector<8x2xf32>
    %c0_3 = arith.constant 0 : index
    %c0_4 = arith.constant 0 : index
    %3 = vector.load %arg2[%c0_3, %c0_4] : memref<8x2xf32, #tpu.memory_space<vmem>>, vector<8x2xf32>
    tpu.vector_store %arg2[%c0_3, %c0_4], %2 {strides = array<i32>} : memref<8x2xf32, #tpu.memory_space<vmem>>, vector<8x2xf32>,
    return
  }
}

</mosaic_0001>

<bundles_post_ra>
// kernel: _gridless_forward.1
= control target key start
LH: loop header
LB: loop body
LE: loop exit
PB: predicated region body
PF: predicated region fallthrough
CT: control target
= control target key end

     0   :  { %7 = vsyncpa [#allocation3], 0  ;;  %s145_s9 = smov [#allocation2]   ;;  %s181_s0 = inlined_call_operand.hbm [shape: f32[8,20], index: 0, kind: input, shape index: {}]   ;;  %s182_s1 = inlined_call_operand.vmem [shape: f32[2,20], index: 1, kind: input, shape index: {}]   ;;  %s183_s2 = inlined_call_operand.vmem [shape: f32[8,2], index: 2, kind: output, shape index: {}]  }
   0x1   :  { %s14_s10 = sshll.u32 %s145_s9, 4  ;;  %s121_s13 = scalar_lea.hbm %s181_s0, 128  ;;  %s15_s10 = int_to_ptr.vmem [resolvable:$true] %s14_s10 }
   0x2   :  { %p122_p0 = scmp.ne.s32.totalorder %s181_s0, %s121_s13  ;;  %p125_p1 = scmp.lt.u32.totalorder %s121_s13, %s181_s0 }
   0x4   :  { %p127_p2 = pnand %p125_p1, %p122_p0 }
   0x6   :  { %130 = shalt.err (!%p127_p2)
}
   0x7   :  { %s131_s18 = scalar_lea.vmem %s15_s10, 128  ;;  %p136_p4 = scmp.lt.s32.totalorder %s15_s10, %s15_s10 }
   0x8   :  { %p132_p3 = scmp.ne.s32.totalorder %s15_s10, %s131_s18  ;;  %p137_p5 = scmp.lt.s32.totalorder %s131_s18, %s131_s18 }
   0xa   :  { %p138_p6 = por %p137_p5, %p136_p4 }
   0xc   :  { %p139_p7 = pnand %p138_p6, %p132_p3 }
   0xe   :  { %142 = shalt.err (!%p139_p7)
}
   0xf   :  { %17 = dma.hbm_to_vmem [thread:$0]  %s181_s0, 128, %s15_s10, [#allocation3]  }
  0x10   :  { %143 = dma.done.wait [#allocation3], 128  }
  0x11   :  { %144 = vsyncadd [#allocation3], 4294967168  ;;  %v146_v0 = vmov 0.0   ;;  %vm147_vm0 = vmmov 0   ;;  %vm25_vm1 = vcmask 162816   ;;  %v23_v2 = vld [vmem:[#allocation2] sm:$0xff] }
  0x12   :  { %113 = vmatprep.subr.mxu0 %v146_v0  ;;  %115 = vmatprep.mubr.msk.f32.mxu0 %vm147_vm0, %v146_v0  ;;  %v24_v1 = vld [vmem:[%s182_s1] sm:$0x3]  ;;  %vm102_vm2 = vcmask 15360  }
  0x13   :  { %114 = vmatpush3.xpose.msk.msra.mxu0 %vm25_vm1, %v24_v1 }
  0x16   :  { %116 = vmatmul.mubr.msk.f32.vlgmr.msra.gmra.mrb[0].mxu0 %vm25_vm1, %v23_v2 }
  0xe9   :  { %v98_v3 = vpop.f32.mrb[0].mxu0 }
  0xea   :  { %103 = vst.msk [vmem:[%s183_s2] sm:$0xff] %vm102_vm2, %v98_v3  ;;  %v117_v4 = vpop.f32.mrb[1].mxu0 }
  0xeb   :  { %108 = vsyncpa [#allocation3], 1 }

</bundles_post_ra>
